<compile_context>
chip_gen: v7x
topology: tpu7x:2x2x1
jax: 0.10.0
libtpu: 0.0.40
codegen_flags: <defaults>
</compile_context>

<pallas_src>
import functools

import jax
import jax.numpy as jnp
from jax.experimental import pallas as pl
from jax.experimental.pallas import tpu as pltpu


def _round_up(x, m):
    return (x + m - 1) // m * m


def _tree_lstm_kernel(x_ref, w_ref, b_ref, out_ref, *, memory_size):
    """x: (Bt, F), w: (F, Np), b: (1, Np), out: (Bt, 2M) = [h | c].

    Np = round_up(3*M, 128). Columns [0:M)=i, [M:2M)=o, [2M:3M)=u (rest is zero pad).
    """
    x = x_ref[...]
    # One fused MXU matmul for all three gates (lane-dense, padded to 128 lanes).
    z = jnp.dot(x, w_ref[...], preferred_element_type=jnp.float32) + b_ref[...]
    m = memory_size
    i = z[:, :m]
    o = z[:, m:2 * m]
    u = z[:, 2 * m:3 * m]
    # Forget gate / fc_sum are dead code in the reference forward (fc_sum is never
    # updated in place), so they are intentionally not computed here.
    c = jax.nn.sigmoid(i) * jnp.tanh(u)
    h = jax.nn.sigmoid(o) * jnp.tanh(c)
    # Single lane-dense store of the whole output tile (no masked sub-128 stores).
    out_ref[...] = jnp.concatenate([h, c], axis=-1).astype(out_ref.dtype)


def prepare_fused_weights(params, compute_dtype=jnp.float32):
    """Fuse gate weights ONCE per model/tree (not per node call).

    Returns:
      W_iou: (F, Np)  with F = input_size + K*M, Np = round_up(3*M, 128)
      b_iou: (1, Np)  float32
    torch.nn.Linear convention: y = x @ W.T + b with W of shape (out, in).
    # On v6e/v7x, pass compute_dtype=jnp.bfloat16 (matmul operands only; the kernel
    # accumulates and does all gate nonlinearities in f32).
    """
    M = params["wi_w"].shape[0]

    def fuse(w, us):
        return jnp.concatenate([w.T] + [u.T for u in us], axis=0)  # (F, M)

    Wi = fuse(params["wi_w"], params["ui_w"])
    Wo = fuse(params["wo_w"], params["uo_w"])
    Wu = fuse(params["wu_w"], params["uu_w"])
    W_iou = jnp.concatenate([Wi, Wo, Wu], axis=1)                            # (F, 3M)
    b_iou = jnp.concatenate([params["wi_b"], params["wo_b"], params["wu_b"]])[None, :]

    n_pad = _round_up(3 * M, 128)
    if n_pad != 3 * M:
        W_iou = jnp.pad(W_iou, ((0, 0), (0, n_pad - 3 * M)))
        b_iou = jnp.pad(b_iou, ((0, 0), (0, n_pad - 3 * M)))
    return W_iou.astype(compute_dtype), b_iou.astype(jnp.float32)


@functools.partial(jax.jit, static_argnames=("memory_size", "tile_b"))
def tree_lstm_unit(inputs, children, w_iou, b_iou, *, memory_size, tile_b=512):
    """Pallas TreeLSTMUnit.forward using pre-fused weights.

    inputs:   (B, input_size)       — fold many tree nodes into B to amortize overhead
    children: (K, B, 2*memory_size)
    returns:  (B, 2*memory_size)  == torch.cat([h, c], dim=1)
    """
    B = inputs.shape[0]
    M = memory_size
    K = children.shape[0]

    child_h = children[:, :, :M]  # (K, B, M)
    # Fused input:  [inputs | child_h_0 | ... | child_h_{K-1}]  -> (B, F)
    x_cat = jnp.concatenate([inputs] + [child_h[k] for k in range(K)], axis=1)
    F = x_cat.shape[1]
    x_cat = x_cat.astype(w_iou.dtype)

    # Tile the batch/node axis; pad rows up to a multiple of the tile.
    tile_b = min(tile_b, _round_up(B, 8))
    b_pad = _round_up(B, tile_b)
    if b_pad != B:
        x_cat = jnp.pad(x_cat, ((0, b_pad - B), (0, 0)))

    n_pad = w_iou.shape[1]
    grid = (b_pad // tile_b,)

    out = pl.pallas_call(
        functools.partial(_tree_lstm_kernel, memory_size=M),
        out_shape=jax.ShapeDtypeStruct((b_pad, 2 * M), inputs.dtype),
        grid_spec=pltpu.PrefetchScalarGridSpec(
            num_scalar_prefetch=0,
            grid=grid,
            in_specs=[
                pl.BlockSpec((tile_b, F), lambda i: (i, 0)),
                pl.BlockSpec((F, n_pad), lambda i: (0, 0)),   # weights stay VMEM-resident
                pl.BlockSpec((1, n_pad), lambda i: (0, 0)),   # fused bias, VMEM-resident
            ],
            out_specs=pl.BlockSpec((tile_b, 2 * M), lambda i: (i, 0)),
        ),
        compiler_params=pltpu.CompilerParams(
            dimension_semantics=("parallel",),  # shard B tiles across v7x's 2 TCs
        ),
    )(x_cat, w_iou, b_iou)
    return out[:B]


def init_params(key, input_size, memory_size, branching_factor):
    """Deterministic params matching TreeLSTMUnit.__init__ (nn.init.normal on all)."""
    n_keys = 8 + 3 * branching_factor + branching_factor * branching_factor
    ks = iter(jax.random.split(key, n_keys))
    p = {}
    for name in ("wi", "wo", "wu", "wf"):
        p[name + "_w"] = jax.random.normal(next(ks), (memory_size, input_size), jnp.float32)
        p[name + "_b"] = jax.random.normal(next(ks), (memory_size,), jnp.float32)
    for name in ("ui", "uo", "uu"):
        p[name + "_w"] = [
            jax.random.normal(next(ks), (memory_size, memory_size), jnp.float32)
            for _ in range(branching_factor)
        ]
    # uf_nets exist in the module but never affect the output (dead code in forward);
    # initialized for parameter-count parity only.
    p["uf_w"] = [
        [jax.random.normal(next(ks), (memory_size, memory_size), jnp.float32)
         for _ in range(branching_factor)]
        for _ in range(branching_factor)
    ]
    return p


def reference(inputs, children, p):
    """Pure-JAX reproduction of the PyTorch forward (ground truth)."""
    M = p["wi_w"].shape[0]
    lin = lambda w, b, x: x @ w.T + b
    i = lin(p["wi_w"], p["wi_b"], inputs)
    o = lin(p["wo_w"], p["wo_b"], inputs)
    u = lin(p["wu_w"], p["wu_b"], inputs)
    for k in range(children.shape[0]):
        ch_h = children[k, :, :M]
        i = i + ch_h @ p["ui_w"][k].T
        o = o + ch_h @ p["uo_w"][k].T
        u = u + ch_h @ p["uu_w"][k].T
    # fc_sum is never updated in place in the reference -> stays zero.
    c = jax.nn.sigmoid(i) * jnp.tanh(u)
    h = jax.nn.sigmoid(o) * jnp.tanh(c)
    return jnp.concatenate([h, c], axis=1)


if __name__ == "__main__":
    INPUT_SIZE, MEMORY_SIZE, BRANCHING = 16, 32, 3

    key = jax.random.PRNGKey(0)
    k_params, k_in, k_child, k_in2, k_child2 = jax.random.split(key, 5)

    params = init_params(k_params, INPUT_SIZE, MEMORY_SIZE, BRANCHING)
    # Fused-weight prep happens ONCE, outside the per-node call.
    W_iou, b_iou = prepare_fused_weights(params)

    # Check 1: small single-node batch (B=8), grid of 1.
    B = 8
    inputs = jax.random.normal(k_in, (B, INPUT_SIZE), jnp.float32)
    children = jax.random.normal(k_child, (BRANCHING, B, 2 * MEMORY_SIZE), jnp.float32)
    arities = jnp.full((B,), BRANCHING, jnp.int32)  # unused by forward(), kept for parity

    out = tree_lstm_unit(inputs, children, W_iou, b_iou, memory_size=MEMORY_SIZE)
    out = jax.block_until_ready(out)
    ref = reference(inputs, children, params)
    assert out.shape == (B, 2 * MEMORY_SIZE)
    assert jnp.allclose(out, ref, atol=1e-5, rtol=1e-5), "mismatch vs pure-JAX reference (B=8)"

    # Check 2: many tree nodes folded into the batch axis (exercises grid > 1 + row padding).
    B2 = 80
    inputs2 = jax.random.normal(k_in2, (B2, INPUT_SIZE), jnp.float32)
    children2 = jax.random.normal(k_child2, (BRANCHING, B2, 2 * MEMORY_SIZE), jnp.float32)
    out2 = tree_lstm_unit(inputs2, children2, W_iou, b_iou,
                          memory_size=MEMORY_SIZE, tile_b=32)
    out2 = jax.block_until_ready(out2)
    ref2 = reference(inputs2, children2, params)
    assert out2.shape == (B2, 2 * MEMORY_SIZE)
    assert jnp.allclose(out2, ref2, atol=1e-5, rtol=1e-5), "mismatch vs pure-JAX reference (B=80)"

    print("KERNEL_OK")
</pallas_src>

<mosaic_0001>
module attributes {stable_mosaic.version = 11 : i64} {
  func.func @_tree_lstm_kernel(%arg0: i32, %arg1: memref<8x112xf32, #tpu.memory_space<vmem>>, %arg2: memref<112x128xf32, #tpu.memory_space<vmem>>, %arg3: memref<1x128xf32, #tpu.memory_space<vmem>>, %arg4: memref<8x64xf32, #tpu.memory_space<vmem>>) attributes {dimension_semantics = [#tpu.dimension_semantics<parallel>], iteration_bounds = array<i64: 1>, scalar_prefetch = 0 : i64, scratch_operands = 0 : i64, tpu.core_type = #tpu.core_type<tc>, window_params = [{transform_indices = @transform_0, window_bounds = array<i64: 8, 112>}, {pipeline_mode = #tpu.pipeline_mode<synchronous>, transform_indices = @transform_1, window_bounds = array<i64: 112, 128>}, {pipeline_mode = #tpu.pipeline_mode<synchronous>, transform_indices = @transform_2, window_bounds = array<i64: 1, 128>}, {transform_indices = @transform_3, window_bounds = array<i64: 8, 64>}]} {
    %c0 = arith.constant 0 : index
    %c0_0 = arith.constant 0 : index
    %0 = vector.load %arg1[%c0, %c0_0] : memref<8x112xf32, #tpu.memory_space<vmem>>, vector<8x112xf32>
    %c0_1 = arith.constant 0 : index
    %c0_2 = arith.constant 0 : index
    %1 = vector.load %arg2[%c0_1, %c0_2] : memref<112x128xf32, #tpu.memory_space<vmem>>, vector<112x128xf32>
    %cst = arith.constant dense<0.000000e+00> : vector<8x128xf32>
    %2 = tpu.matmul %0, %1, %cst {dimension_numbers = #tpu.dot_dimension_numbers<[1], [0], [0], [1], [0, 0, 1, 1], [], []>} : vector<8x112xf32>, vector<112x128xf32>, vector<8x128xf32> -> vector<8x128xf32>
    %c0_3 = arith.constant 0 : index
    %c0_4 = arith.constant 0 : index
    %3 = vector.load %arg3[%c0_3, %c0_4] : memref<1x128xf32, #tpu.memory_space<vmem>>, vector<1x128xf32>
    %4 = vector.broadcast %3 : vector<1x128xf32> to vector<8x128xf32>
    %5 = arith.addf %2, %4 : vector<8x128xf32>
    %6 = vector.extract_strided_slice %5 {offsets = [0, 0], sizes = [8, 32], strides = [1, 1]} : vector<8x128xf32> to vector<8x32xf32>
    %7 = vector.extract_strided_slice %5 {offsets = [0, 32], sizes = [8, 32], strides = [1, 1]} : vector<8x128xf32> to vector<8x32xf32>
    %8 = vector.extract_strided_slice %5 {offsets = [0, 64], sizes = [8, 32], strides = [1, 1]} : vector<8x128xf32> to vector<8x32xf32>
    %9 = arith.negf %6 : vector<8x32xf32>
    %10 = math.exp %9 : vector<8x32xf32>
    %cst_5 = arith.constant 1.000000e+00 : f32
    %11 = vector.broadcast %cst_5 : f32 to vector<8x32xf32>
    %12 = arith.addf %11, %10 : vector<8x32xf32>
    %13 = arith.divf %11, %12 : vector<8x32xf32>
    %14 = math.tanh %8 : vector<8x32xf32>
    %15 = arith.mulf %13, %14 : vector<8x32xf32>
    %16 = arith.negf %7 : vector<8x32xf32>
    %17 = math.exp %16 : vector<8x32xf32>
    %cst_6 = arith.constant 1.000000e+00 : f32
    %18 = vector.broadcast %cst_6 : f32 to vector<8x32xf32>
    %19 = arith.addf %18, %17 : vector<8x32xf32>
    %20 = arith.divf %18, %19 : vector<8x32xf32>
    %21 = math.tanh %15 : vector<8x32xf32>
    %22 = arith.mulf %20, %21 : vector<8x32xf32>
    %23 = tpu.concatenate %22, %15 in 1 : vector<8x32xf32>, vector<8x32xf32> -> vector<8x64xf32>
    %c0_7 = arith.constant 0 : index
    %c0_8 = arith.constant 0 : index
    %24 = vector.load %arg4[%c0_7, %c0_8] : memref<8x64xf32, #tpu.memory_space<vmem>>, vector<8x64xf32>
    tpu.vector_store %arg4[%c0_7, %c0_8], %23 {strides = array<i32>} : memref<8x64xf32, #tpu.memory_space<vmem>>, vector<8x64xf32>,
    return
  }
  func.func @transform_0(%arg0: i32) -> (i32, i32) {
    %c0_i32 = arith.constant 0 : i32
    %c0_i32_0 = arith.constant 0 : i32
    return %arg0, %c0_i32 : i32, i32
  }
  func.func @transform_1(%arg0: i32) -> (i32, i32) {
    %c0_i32 = arith.constant 0 : i32
    %c0_i32_0 = arith.constant 0 : i32
    %c0_i32_1 = arith.constant 0 : i32
    return %c0_i32, %c0_i32_0 : i32, i32
  }
  func.func @transform_2(%arg0: i32) -> (i32, i32) {
    %c0_i32 = arith.constant 0 : i32
    %c0_i32_0 = arith.constant 0 : i32
    %c0_i32_1 = arith.constant 0 : i32
    return %c0_i32, %c0_i32_0 : i32, i32
  }
  func.func @transform_3(%arg0: i32) -> (i32, i32) {
    %c0_i32 = arith.constant 0 : i32
    %c0_i32_0 = arith.constant 0 : i32
    return %arg0, %c0_i32 : i32, i32
  }
}

</mosaic_0001>

<bundles_post_ra>
// kernel: tree_lstm_unit.1
= control target key start
LH: loop header
LB: loop body
LE: loop exit
PB: predicated region body
PF: predicated region fallthrough
CT: control target
= control target key end

     0   :  { %8 = vsyncpa [#allocation3], 0  ;;  %s366_s0 = inlined_call_operand.vmem [shape: f32[8,112], index: 0, kind: input, shape index: {}]   ;;  %s367_s1 = inlined_call_operand.hbm [shape: f32[112,128], index: 1, kind: input, shape index: {}]   ;;  %s368_s2 = inlined_call_operand.vmem [shape: f32[1,128], index: 2, kind: input, shape index: {}]   ;;  %s369_s3 = inlined_call_operand.hbm [shape: f32[8,64], index: 3, kind: output, shape index: {}]  }
   0x1   :  { %9 = vsyncpa [#allocation4], 0  ;;  %s306_s12 = smov [#allocation2]   ;;  %s258_s16 = scalar_lea.hbm %s367_s1, 1792 }
   0x2   :  { %s17_s13 = sshll.u32 %s306_s12, 4  ;;  %p259_p0 = scmp.ne.s32.totalorder %s367_s1, %s258_s16  ;;  %s18_s13 = int_to_ptr.vmem [resolvable:$true] %s17_s13 }
   0x3   :  { %p262_p1 = scmp.lt.u32.totalorder %s258_s16, %s367_s1 }
   0x5   :  { %p264_p2 = pnand %p262_p1, %p259_p0 }
   0x7   :  { %267 = shalt.err (!%p264_p2)
}
   0x8   :  { %s268_s21 = scalar_lea.vmem %s18_s13, 1792  ;;  %p273_p4 = scmp.lt.s32.totalorder %s18_s13, %s18_s13 }
   0x9   :  { %p269_p3 = scmp.ne.s32.totalorder %s18_s13, %s268_s21  ;;  %p274_p5 = scmp.lt.s32.totalorder %s268_s21, %s268_s21 }
   0xb   :  { %p275_p6 = por %p274_p5, %p273_p4 }
   0xd   :  { %p276_p7 = pnand %p275_p6, %p269_p3 }
   0xf   :  { %279 = shalt.err (!%p276_p7)
}
  0x10   :  { %s307_s22 = smov 128   ;;  %s308_s23 = smov 8  }
  0x11   :  { %23 = dma.hbm_to_vmem [thread:$0]  %s367_s1, 1792, %s18_s13, [#allocation3], %s307_s22, %s307_s22, %s308_s23  }
  0x12   :  { %302 = dma.done.wait [#allocation3], 1792  }
  0x13   :  { %303 = vsyncadd [#allocation3], 4294965504  ;;  %v309_v0 = vmov 0.0|0.0   ;;  %vm310_vm0 = vmmov 0   ;;  %v311_v1 = vmov 0.0   ;;  %v30_v2 = vld [vmem:[#allocation2] sm:$0xff] }
  0x14   :  { %219 = vmatprep.subr.bf16.mxu0 %v309_v0  ;;  %216 = vmatprep.mubr.msk.f32.mxu0 %vm310_vm0, %v311_v1  ;;  %v31_v3 = vld [vmem:[#allocation2 + $0x8] sm:$0xff]  ;;  %v32_v4 = vld [vmem:[#allocation2 + $0x10] sm:$0xff]  ;;  %v33_v6 = vld [vmem:[#allocation2 + $0x18] sm:$0xff]  ;;  %vm51_vm1 = vcmask 916480   ;;  %s312_s29 = smov 64   ;;  %s315_s30 = smov [#allocation5]  }
  0x15   :  { %v220_v5 = vpack.c.bf16 %v31_v3, %v30_v2  ;;  %v223_v7 = vpack.c.bf16 %v33_v6, %v32_v4  ;;  %v34_v8 = vld [vmem:[#allocation2 + $0x20] sm:$0xff]  ;;  %v35_v9 = vld [vmem:[#allocation2 + $0x28] sm:$0xff]  ;;  %v36_v11 = vld [vmem:[#allocation2 + $0x30] sm:$0xff]  ;;  %s161_s4 = sshll.u32 %s315_s30, 4  ;;  %vm151_vm2 = vcmask 261120   ;;  %vm153_vm3 = vcmask 523264   ;;  %s162_s4 = int_to_ptr.vmem [resolvable:$true] %s161_s4 }
  0x16   :  { %v226_v10 = vpack.c.bf16 %v35_v9, %v34_v8  ;;  %v37_v12 = vld [vmem:[#allocation2 + $0x38] sm:$0xff]  ;;  %v38_v14 = vld [vmem:[#allocation2 + $0x40] sm:$0xff]  ;;  %v39_v15 = vld [vmem:[#allocation2 + $0x48] sm:$0xff]  ;;  %s280_s5 = scalar_lea.vmem %s162_s4, 128  ;;  %p285_p9 = scmp.lt.s32.totalorder %s162_s4, %s162_s4 }
  0x17   :  { %221 = vmatpush3.bf16.msra.mxu0 %v220_v5  ;;  %v229_v13 = vpack.c.bf16 %v37_v12, %v36_v11  ;;  %v232_v16 = vpack.c.bf16 %v39_v15, %v38_v14  ;;  %v40_v17 = vld [vmem:[#allocation2 + $0x50] sm:$0xff]  ;;  %v41_v18 = vld [vmem:[#allocation2 + $0x58] sm:$0xff]  ;;  %v42_v20 = vld [vmem:[#allocation2 + $0x60] sm:$0xff]  ;;  %p281_p8 = scmp.ne.s32.totalorder %s162_s4, %s280_s5  ;;  %p286_p10 = scmp.lt.s32.totalorder %s280_s5, %s280_s5 }
  0x18   :  { %222 = vmatprep.subr.bf16.mxu0 %v309_v0  ;;  %v235_v19 = vpack.c.bf16 %v41_v18, %v40_v17  ;;  %v43_v21 = vld [vmem:[#allocation2 + $0x68] sm:$0xff]  ;;  %v29_v23 = vld [vmem:[%s366_s0] sm:$0xff]  ;;  %s313_s0 = smov 32  }
  0x19   :  { %v238_v22 = vpack.c.bf16 %v43_v21, %v42_v20  ;;  %v170_v24 = vld [vmem:[%s368_s2] ss:$0 sm:$0xff]  ;;  %s314_s2 = smov 96   ;;  %p287_p11 = por %p286_p10, %p285_p9 }
  0x1b   :  { %224 = vmatpush3.bf16.msra.mxu0 %v223_v7  ;;  %p288_p12 = pnand %p287_p11, %p281_p8 }
  0x1c   :  { %225 = vmatprep.subr.bf16.mxu0 %v309_v0 }
  0x1f   :  { %227 = vmatpush3.bf16.msra.mxu0 %v226_v10 }
  0x20   :  { %228 = vmatprep.subr.bf16.mxu0 %v309_v0 }
  0x23   :  { %230 = vmatpush3.bf16.msra.mxu0 %v229_v13 }
  0x24   :  { %231 = vmatprep.subr.bf16.mxu0 %v309_v0 }
  0x27   :  { %233 = vmatpush3.bf16.msra.mxu0 %v232_v16 }
  0x28   :  { %234 = vmatprep.subr.bf16.mxu0 %v309_v0 }
  0x2b   :  { %236 = vmatpush3.bf16.msra.mxu0 %v235_v19 }
  0x2c   :  { %237 = vmatprep.subr.bf16.mxu0 %v309_v0 }
  0x2f   :  { %239 = vmatpush3.bf16.msra.mxu0 %v238_v22 }
  0x32   :  { %217 = vmatmul.mubr.msk.f32.vlgmr.msra.gmra.mrb[0].mxu0 %vm51_vm1, %v29_v23 }
 0x105   :  { %v121_v25 = vpop.f32.mrb[0].mxu0 }
 0x106   :  { %v122_v26 = vadd.f32 %v170_v24, %v121_v25  ;;  %v218_v27 = vpop.f32.mrb[1].mxu0 }
 0x108   :  { %250 = vtanh.f32 %v122_v26  ;;  %v172_v29 = vmul.f32 -1.442695, %v122_v26 }
 0x10a   :  { %252 = vpow2.f32 %v172_v29 }
 0x112   :  { %v251_v28 = vpop.eup %250 }
 0x113   :  { %133 = vrot.lane.b32.xlu0 %v251_v28, %s312_s29 }
 0x114   :  { %v253_v30 = vpop.eup %252 }
 0x115   :  { %v128_v31 = vadd.f32 1.0, %v253_v30 }
 0x117   :  { %254 = vrcp.f32 %v128_v31 }
 0x121   :  { %v255_v32 = vpop.eup %254 }
 0x185   :  { %v134_v33 = vpop.permute.xlu0 %133 }
 0x186   :  { %v136_v34 = vmul.f32 %v255_v32, %v134_v33 }
 0x188   :  { %256 = vtanh.f32 %v136_v34 }
 0x192   :  { %v257_v35 = vpop.eup %256 }
 0x193   :  { %139 = vrot.lane.b32.xlu0 %v257_v35, %s313_s0 }
 0x205   :  { %v140_v36 = vpop.permute.xlu0 %139 }
 0x206   :  { %v142_v37 = vmul.f32 %v255_v32, %v140_v36 }
 0x208   :  { %144 = vrot.lane.b32.xlu1 %v142_v37, %s314_s2 }
 0x20c   :  { %148 = vrot.lane.b32.xlu1 %v136_v34, %s313_s0 }
 0x27a   :  { %v145_v38 = vpop.permute.xlu1 %144 }
 0x27e   :  { %v149_v39 = vpop.permute.xlu1 %148 }
 0x27f   :  { %v152_v40 = vsel %vm151_vm2, %v145_v38, %v149_v39 }
 0x280   :  { %154 = vst.msk [vmem:[#allocation5] sm:$0xff] %vm153_vm3, %v152_v40 }
 0x281   :  { %291 = shalt.err (!%p288_p12)
}
 0x282   :  { %s292_s8 = scalar_lea.hbm %s369_s3, 128 }
 0x283   :  { %p293_p13 = scmp.ne.s32.totalorder %s369_s3, %s292_s8  ;;  %p296_p0 = scmp.lt.u32.totalorder %s292_s8, %s369_s3 }
 0x285   :  { %p298_p1 = pnand %p296_p0, %p293_p13 }
 0x287   :  { %301 = shalt.err (!%p298_p1)
}
 0x288   :  { %164 = dma.vmem_to_hbm [thread:$0]  %s162_s4, 128, %s369_s3, [#allocation4]  }
 0x289   :  { %304 = dma.done.wait [#allocation4], 128  }
 0x28a   :  { %305 = vsyncadd [#allocation4], 4294967168 }
 0x28b   :  { %168 = vsyncpa [#allocation3], 1 }
 0x28c   :  { %169 = vsyncpa [#allocation4], 1 }

</bundles_post_ra>
